<compile_context>
chip_gen: v7x
topology: tpu7x:2x2x1
jax: 0.10.0
libtpu: 0.0.40
codegen_flags: <defaults>
</compile_context>

<pallas_src>
import functools

import jax
import jax.numpy as jnp
from jax.experimental import pallas as pl
from jax.experimental.pallas import tpu as pltpu


def _diffscm_kernel(
    tile_n,        # static: rows per grid step
    inv_nm1,       # static: 1 / (n_rows - 1) for the in-kernel linspace
    x_ref,         # (TILE_N, D)   original input x
    t_rand_ref,    # (TILE_N, 1)   torch.rand(x.shape[0], 1)
    noise_ref,     # (TILE_N, D)   diffusion noise
    x0_ref,        # (TILE_N, D)   diffusion starting point
    eps_ref,       # (TILE_N, D)   reparameterization noise
    w_stack_ref,   # (2, D, D)     [w1x, w2], pre-transposed to (in, out)
    wmv_ref,       # (D, 2D)       fused [mean | var] head weights (in, out)
    aux_ref,       # (8, D)        rows: [w1t, b1, b2, bm, bv, 0, 0, 0]
    out_ref,       # (TILE_N, D)
):
    d = out_ref.shape[-1]

    # --- per-row t from linspace(0, 1, n_rows), generated on-chip -------------
    row0 = pl.program_id(0) * tile_n
    row_ids = jax.lax.broadcasted_iota(jnp.int32, (tile_n, d), 0) + row0
    # clamp so zero-padded tail rows (row >= n_rows) stay finite (sqrt(1-t)>=0)
    t_lin = jnp.minimum(row_ids.astype(jnp.float32) * inv_nm1, 1.0)

    one_minus_t = 1.0 - t_lin                  # reused twice (CSE hoist)
    sqrt_omt = jnp.sqrt(one_minus_t)

    x = x_ref[...]
    t_rand = t_rand_ref[...]
    noise = noise_ref[...]
    x0 = x0_ref[...]
    eps = eps_ref[...]

    w1x = w_stack_ref[0]
    w2 = w_stack_ref[1]
    w1t = aux_ref[0:1, :]
    b1 = aux_ref[1:2, :]
    b2 = aux_ref[2:3, :]
    bm = aux_ref[3:4, :]
    bv = aux_ref[4:5, :]

    # --- DiffusionFunction, batched over rows ---------------------------------
    # noise_t = noise * sqrt(1 - t);  xt' = x0 + noise_t
    xt_prime = x0 + noise * sqrt_omt

    # net = Linear(D+1, D) -> ReLU -> Linear(D, D) -> Tanh
    # cat([xt', t]) @ W1  ==  xt' @ W1[:D, :] + t * W1[D, :]
    h = jnp.dot(xt_prime, w1x, preferred_element_type=jnp.float32)
    h = jnp.maximum(h + t_lin * w1t + b1, 0.0)

    ft = jnp.tanh(jnp.dot(h, w2, preferred_element_type=jnp.float32) + b2)
    xt = xt_prime + one_minus_t * ft

    # --- fused mean / var heads (one (D, 2D) matmul) ---------------------------
    mv = jnp.dot(xt, wmv_ref[...], preferred_element_type=jnp.float32)
    mu = mv[:, :d] + bm
    sv = mv[:, d:] + bv
    # stable softplus: max(x, 0) + log1p(exp(-|x|))
    sigma = jnp.maximum(sv, 0.0) + jnp.log1p(jnp.exp(-jnp.abs(sv)))

    # --- reparameterized mixing ------------------------------------------------
    x_prime = mu + sigma * eps
    one_minus_tr = 1.0 - t_rand
    out_ref[...] = one_minus_tr * x + t_rand * x_prime


def _auto_row_cap(d):
    """Largest multiple-of-8 row tile keeping double-buffered activation
    tiles (5 inputs + 1 output, f32) within a budget that fits every TPU
    generation's scoped VMEM (including v7x's 64 MiB physical VMEM)."""
    budget = 8 * 1024 * 1024               # bytes for double-buffered row tiles
    per_row = (6 * d + 1) * 4 * 2          # 6 D-wide streams + t_rand col, 2 bufs
    return max(8, min(1024, (budget // per_row) // 8 * 8))


@functools.partial(jax.jit, static_argnames=("max_tile_n",))
def diffscm_forward(x, t_rand, noise, x0, eps, params, *, max_tile_n=1024):
    """Runs the DiffSCM forward pass as one row-tiled Pallas kernel."""
    n, d = x.shape

    tile_n = min(n, max_tile_n, _auto_row_cap(d))
    if tile_n < n:
        tile_n = max(8, (tile_n // 8) * 8)   # (8,128) rule on the sublane dim
    n_pad = ((n + tile_n - 1) // tile_n) * tile_n

    if n_pad != n:
        rows_pad = ((0, n_pad - n), (0, 0))
        x, t_rand, noise, x0, eps = [
            jnp.pad(a, rows_pad) for a in (x, t_rand, noise, x0, eps)
        ]

    inv_nm1 = 1.0 / float(max(n - 1, 1))
    kernel = functools.partial(_diffscm_kernel, tile_n, inv_nm1)

    act_spec = pl.BlockSpec((tile_n, d), lambda i: (i, 0))
    col_spec = pl.BlockSpec((tile_n, 1), lambda i: (i, 0))
    w_stack_spec = pl.BlockSpec((2, d, d), lambda i: (0, 0, 0))
    wmv_spec = pl.BlockSpec((d, 2 * d), lambda i: (0, 0))
    aux_spec = pl.BlockSpec((8, d), lambda i: (0, 0))

    grid = (n_pad // tile_n,)

    out = pl.pallas_call(
        kernel,
        out_shape=jax.ShapeDtypeStruct((n_pad, d), jnp.float32),
        grid_spec=pltpu.PrefetchScalarGridSpec(
            num_scalar_prefetch=0,
            grid=grid,
            in_specs=[act_spec, col_spec, act_spec, act_spec, act_spec,
                      w_stack_spec, wmv_spec, aux_spec],
            out_specs=act_spec,
        ),
        compiler_params=pltpu.CompilerParams(
            dimension_semantics=("parallel",),
            vmem_limit_bytes=32 * 1024 * 1024,   # explicit; fits v5e/v6e/v7x
        ),
    )(x, t_rand, noise, x0, eps,
      params["w_stack"], params["wmv"], params["aux"])

    return out[:n] if n_pad != n else out


def _init_linear(key, fan_in, fan_out):
    """PyTorch-style uniform init; returns torch-layout (out, in) W and bias."""
    kw, kb = jax.random.split(key)
    bound = 1.0 / jnp.sqrt(jnp.float32(fan_in))
    w = jax.random.uniform(kw, (fan_out, fan_in), jnp.float32, -bound, bound)
    b = jax.random.uniform(kb, (fan_out,), jnp.float32, -bound, bound)
    return w, b


def make_params(key, dims):
    k1, k2, km, kv = jax.random.split(key, 4)
    # diffusion.net[0]: Linear(dims+1, dims)
    w1, b1 = _init_linear(k1, dims + 1, dims)
    w1x = w1[:, :dims].T                       # (in, out)
    w1t = w1[:, dims]                          # weight column for appended t
    # diffusion.net[2]: Linear(dims, dims)
    w2, b2 = _init_linear(k2, dims, dims)
    # mean: Linear(dims, dims);  var[0]: Linear(dims, dims)
    wm, bm = _init_linear(km, dims, dims)
    wv, bv = _init_linear(kv, dims, dims)

    w_stack = jnp.stack([w1x, w2.T], axis=0)               # (2, dims, dims)
    wmv = jnp.concatenate([wm.T, wv.T], axis=1)            # (dims, 2*dims)
    aux = jnp.zeros((8, dims), jnp.float32)
    aux = (aux.at[0].set(w1t).at[1].set(b1).at[2].set(b2)
              .at[3].set(bm).at[4].set(bv))
    return {"w_stack": w_stack, "wmv": wmv, "aux": aux}


def diffscm_reference(x, t_rand, noise, x0, eps, params):
    """Plain-JAX reference mirroring the PyTorch forward semantics."""
    n, d = x.shape
    w1x = params["w_stack"][0]
    w2 = params["w_stack"][1]
    wmv = params["wmv"]
    aux = params["aux"]
    w1t, b1, b2, bm, bv = aux[0:1], aux[1:2], aux[2:3], aux[3:4], aux[4:5]

    # torch.linspace(0, 1, n)
    t_lin = (jnp.arange(n, dtype=jnp.float32) / float(max(n - 1, 1))).reshape(n, 1)

    xt_prime = x0 + noise * jnp.sqrt(1.0 - t_lin)
    h = jnp.maximum(xt_prime @ w1x + t_lin * w1t + b1, 0.0)
    ft = jnp.tanh(h @ w2 + b2)
    xt = xt_prime + (1.0 - t_lin) * ft

    mv = xt @ wmv
    mu = mv[:, :d] + bm
    sigma = jax.nn.softplus(mv[:, d:] + bv)
    x_prime = mu + sigma * eps
    return (1.0 - t_rand) * x + t_rand * x_prime


if __name__ == "__main__":
    DIMS = 32
    N = 60            # deliberately not a tile multiple -> exercises padding

    key = jax.random.PRNGKey(0)
    k_param, k_x, k_t, k_noise, k_x0, k_eps = jax.random.split(key, 6)

    params = make_params(k_param, DIMS)

    x = jax.random.normal(k_x, (N, DIMS), jnp.float32)
    t_rand = jax.random.uniform(k_t, (N, 1), jnp.float32)        # torch.rand(N, 1)
    noise = jax.random.normal(k_noise, (N, DIMS), jnp.float32)   # sample() noise
    x0 = jax.random.normal(k_x0, (N, DIMS), jnp.float32)         # sample() x0
    eps = jax.random.normal(k_eps, (N, DIMS), jnp.float32)       # reparam eps

    # max_tile_n=16 forces a 4-step row grid at this small demo size so the
    # pipelined/tiled path (and the padding path) is actually exercised.
    out = diffscm_forward(x, t_rand, noise, x0, eps, params, max_tile_n=16)
    out = jax.block_until_ready(out)

    ref = diffscm_reference(x, t_rand, noise, x0, eps, params)
    assert out.shape == (N, DIMS)
    assert jnp.allclose(out, ref, atol=1e-5, rtol=1e-5), "Pallas output mismatch"

    print("KERNEL_OK")
</pallas_src>

<mosaic_0001>
module attributes {stable_mosaic.version = 11 : i64} {
  func.func @_diffscm_kernel(%arg0: i32, %arg1: memref<16x32xf32, #tpu.memory_space<vmem>>, %arg2: memref<16x1xf32, #tpu.memory_space<vmem>>, %arg3: memref<16x32xf32, #tpu.memory_space<vmem>>, %arg4: memref<16x32xf32, #tpu.memory_space<vmem>>, %arg5: memref<16x32xf32, #tpu.memory_space<vmem>>, %arg6: memref<2x32x32xf32, #tpu.memory_space<vmem>>, %arg7: memref<32x64xf32, #tpu.memory_space<vmem>>, %arg8: memref<8x32xf32, #tpu.memory_space<vmem>>, %arg9: memref<16x32xf32, #tpu.memory_space<vmem>>) attributes {dimension_semantics = [#tpu.dimension_semantics<parallel>], iteration_bounds = array<i64: 4>, scalar_prefetch = 0 : i64, scratch_operands = 0 : i64, tpu.core_type = #tpu.core_type<tc>, window_params = [{transform_indices = @transform_0, window_bounds = array<i64: 16, 32>}, {transform_indices = @transform_1, window_bounds = array<i64: 16, 1>}, {transform_indices = @transform_2, window_bounds = array<i64: 16, 32>}, {transform_indices = @transform_3, window_bounds = array<i64: 16, 32>}, {transform_indices = @transform_4, window_bounds = array<i64: 16, 32>}, {pipeline_mode = #tpu.pipeline_mode<synchronous>, transform_indices = @transform_5, window_bounds = array<i64: 2, 32, 32>}, {pipeline_mode = #tpu.pipeline_mode<synchronous>, transform_indices = @transform_6, window_bounds = array<i64: 32, 64>}, {pipeline_mode = #tpu.pipeline_mode<synchronous>, transform_indices = @transform_7, window_bounds = array<i64: 8, 32>}, {transform_indices = @transform_8, window_bounds = array<i64: 16, 32>}]} {
    %c16_i32 = arith.constant 16 : i32
    %0 = arith.muli %arg0, %c16_i32 : i32
    %1 = tpu.iota {dimensions = array<i32: 0>} : vector<16x32xi32>
    %2 = vector.broadcast %0 : i32 to vector<16x32xi32>
    %3 = arith.addi %1, %2 : vector<16x32xi32>
    %4 = arith.sitofp %3 : vector<16x32xi32> to vector<16x32xf32>
    %cst = arith.constant 0.0169491526 : f32
    %5 = vector.broadcast %cst : f32 to vector<16x32xf32>
    %6 = arith.mulf %4, %5 : vector<16x32xf32>
    %cst_0 = arith.constant 1.000000e+00 : f32
    %7 = vector.broadcast %cst_0 : f32 to vector<16x32xf32>
    %8 = arith.minimumf %6, %7 : vector<16x32xf32>
    %cst_1 = arith.constant 1.000000e+00 : f32
    %9 = vector.broadcast %cst_1 : f32 to vector<16x32xf32>
    %10 = arith.subf %9, %8 : vector<16x32xf32>
    %11 = math.sqrt %10 : vector<16x32xf32>
    %c0 = arith.constant 0 : index
    %c0_2 = arith.constant 0 : index
    %12 = vector.load %arg1[%c0, %c0_2] : memref<16x32xf32, #tpu.memory_space<vmem>>, vector<16x32xf32>
    %c0_3 = arith.constant 0 : index
    %c0_4 = arith.constant 0 : index
    %13 = vector.load %arg2[%c0_3, %c0_4] : memref<16x1xf32, #tpu.memory_space<vmem>>, vector<16x1xf32>
    %c0_5 = arith.constant 0 : index
    %c0_6 = arith.constant 0 : index
    %14 = vector.load %arg3[%c0_5, %c0_6] : memref<16x32xf32, #tpu.memory_space<vmem>>, vector<16x32xf32>
    %c0_7 = arith.constant 0 : index
    %c0_8 = arith.constant 0 : index
    %15 = vector.load %arg4[%c0_7, %c0_8] : memref<16x32xf32, #tpu.memory_space<vmem>>, vector<16x32xf32>
    %c0_9 = arith.constant 0 : index
    %c0_10 = arith.constant 0 : index
    %16 = vector.load %arg5[%c0_9, %c0_10] : memref<16x32xf32, #tpu.memory_space<vmem>>, vector<16x32xf32>
    %c0_11 = arith.constant 0 : index
    %c0_12 = arith.constant 0 : index
    %c0_13 = arith.constant 0 : index
    %17 = vector.load %arg6[%c0_11, %c0_12, %c0_13] : memref<2x32x32xf32, #tpu.memory_space<vmem>>, vector<1x32x32xf32>
    %18 = vector.shape_cast %17 : vector<1x32x32xf32> to vector<32x32xf32>
    %c1 = arith.constant 1 : index
    %c0_14 = arith.constant 0 : index
    %c0_15 = arith.constant 0 : index
    %19 = vector.load %arg6[%c1, %c0_14, %c0_15] : memref<2x32x32xf32, #tpu.memory_space<vmem>>, vector<1x32x32xf32>
    %20 = vector.shape_cast %19 : vector<1x32x32xf32> to vector<32x32xf32>
    %c0_16 = arith.constant 0 : index
    %c0_17 = arith.constant 0 : index
    %21 = vector.load %arg8[%c0_16, %c0_17] : memref<8x32xf32, #tpu.memory_space<vmem>>, vector<1x32xf32>
    %c1_18 = arith.constant 1 : index
    %c0_19 = arith.constant 0 : index
    %22 = vector.load %arg8[%c1_18, %c0_19] : memref<8x32xf32, #tpu.memory_space<vmem>>, vector<1x32xf32>
    %c2 = arith.constant 2 : index
    %c0_20 = arith.constant 0 : index
    %23 = vector.load %arg8[%c2, %c0_20] : memref<8x32xf32, #tpu.memory_space<vmem>>, vector<1x32xf32>
    %c3 = arith.constant 3 : index
    %c0_21 = arith.constant 0 : index
    %24 = vector.load %arg8[%c3, %c0_21] : memref<8x32xf32, #tpu.memory_space<vmem>>, vector<1x32xf32>
    %c4 = arith.constant 4 : index
    %c0_22 = arith.constant 0 : index
    %25 = vector.load %arg8[%c4, %c0_22] : memref<8x32xf32, #tpu.memory_space<vmem>>, vector<1x32xf32>
    %26 = arith.mulf %14, %11 : vector<16x32xf32>
    %27 = arith.addf %15, %26 : vector<16x32xf32>
    %cst_23 = arith.constant dense<0.000000e+00> : vector<16x32xf32>
    %28 = tpu.matmul %27, %18, %cst_23 {dimension_numbers = #tpu.dot_dimension_numbers<[1], [0], [0], [1], [0, 0, 1, 1], [], []>} : vector<16x32xf32>, vector<32x32xf32>, vector<16x32xf32> -> vector<16x32xf32>
    %29 = vector.broadcast %21 : vector<1x32xf32> to vector<16x32xf32>
    %30 = arith.mulf %8, %29 : vector<16x32xf32>
    %31 = arith.addf %28, %30 : vector<16x32xf32>
    %32 = vector.broadcast %22 : vector<1x32xf32> to vector<16x32xf32>
    %33 = arith.addf %31, %32 : vector<16x32xf32>
    %cst_24 = arith.constant 0.000000e+00 : f32
    %34 = vector.broadcast %cst_24 : f32 to vector<16x32xf32>
    %35 = arith.maximumf %33, %34 : vector<16x32xf32>
    %cst_25 = arith.constant dense<0.000000e+00> : vector<16x32xf32>
    %36 = tpu.matmul %35, %20, %cst_25 {dimension_numbers = #tpu.dot_dimension_numbers<[1], [0], [0], [1], [0, 0, 1, 1], [], []>} : vector<16x32xf32>, vector<32x32xf32>, vector<16x32xf32> -> vector<16x32xf32>
    %37 = vector.broadcast %23 : vector<1x32xf32> to vector<16x32xf32>
    %38 = arith.addf %36, %37 : vector<16x32xf32>
    %39 = math.tanh %38 : vector<16x32xf32>
    %40 = arith.mulf %10, %39 : vector<16x32xf32>
    %41 = arith.addf %27, %40 : vector<16x32xf32>
    %c0_26 = arith.constant 0 : index
    %c0_27 = arith.constant 0 : index
    %42 = vector.load %arg7[%c0_26, %c0_27] : memref<32x64xf32, #tpu.memory_space<vmem>>, vector<32x64xf32>
    %cst_28 = arith.constant dense<0.000000e+00> : vector<16x64xf32>
    %43 = tpu.matmul %41, %42, %cst_28 {dimension_numbers = #tpu.dot_dimension_numbers<[1], [0], [0], [1], [0, 0, 1, 1], [], []>} : vector<16x32xf32>, vector<32x64xf32>, vector<16x64xf32> -> vector<16x64xf32>
    %44 = vector.extract_strided_slice %43 {offsets = [0, 0], sizes = [16, 32], strides = [1, 1]} : vector<16x64xf32> to vector<16x32xf32>
    %45 = vector.broadcast %24 : vector<1x32xf32> to vector<16x32xf32>
    %46 = arith.addf %44, %45 : vector<16x32xf32>
    %47 = vector.extract_strided_slice %43 {offsets = [0, 32], sizes = [16, 32], strides = [1, 1]} : vector<16x64xf32> to vector<16x32xf32>
    %48 = vector.broadcast %25 : vector<1x32xf32> to vector<16x32xf32>
    %49 = arith.addf %47, %48 : vector<16x32xf32>
    %cst_29 = arith.constant 0.000000e+00 : f32
    %50 = vector.broadcast %cst_29 : f32 to vector<16x32xf32>
    %51 = arith.maximumf %49, %50 : vector<16x32xf32>
    %52 = math.absf %49 : vector<16x32xf32>
    %cst_30 = arith.constant 0.000000e+00 : f32
    %53 = vector.broadcast %cst_30 : f32 to vector<16x32xf32>
    %54 = arith.subf %53, %52 : vector<16x32xf32>
    %55 = math.exp %54 : vector<16x32xf32>
    %56 = math.log1p %55 : vector<16x32xf32>
    %57 = arith.addf %51, %56 : vector<16x32xf32>
    %58 = arith.mulf %57, %16 : vector<16x32xf32>
    %59 = arith.addf %46, %58 : vector<16x32xf32>
    %cst_31 = arith.constant 1.000000e+00 : f32
    %60 = vector.broadcast %cst_31 : f32 to vector<16x1xf32>
    %61 = arith.subf %60, %13 : vector<16x1xf32>
    %62 = vector.broadcast %61 : vector<16x1xf32> to vector<16x32xf32>
    %63 = arith.mulf %62, %12 : vector<16x32xf32>
    %64 = vector.broadcast %13 : vector<16x1xf32> to vector<16x32xf32>
    %65 = arith.mulf %64, %59 : vector<16x32xf32>
    %66 = arith.addf %63, %65 : vector<16x32xf32>
    %c0_32 = arith.constant 0 : index
    %c0_33 = arith.constant 0 : index
    %67 = vector.load %arg9[%c0_32, %c0_33] : memref<16x32xf32, #tpu.memory_space<vmem>>, vector<16x32xf32>
    tpu.vector_store %arg9[%c0_32, %c0_33], %66 {strides = array<i32>} : memref<16x32xf32, #tpu.memory_space<vmem>>, vector<16x32xf32>,
    return
  }
  func.func @transform_0(%arg0: i32) -> (i32, i32) {
    %c0_i32 = arith.constant 0 : i32
    %c0_i32_0 = arith.constant 0 : i32
    return %arg0, %c0_i32 : i32, i32
  }
  func.func @transform_1(%arg0: i32) -> (i32, i32) {
    %c0_i32 = arith.constant 0 : i32
    %c0_i32_0 = arith.constant 0 : i32
    return %arg0, %c0_i32 : i32, i32
  }
  func.func @transform_2(%arg0: i32) -> (i32, i32) {
    %c0_i32 = arith.constant 0 : i32
    %c0_i32_0 = arith.constant 0 : i32
    return %arg0, %c0_i32 : i32, i32
  }
  func.func @transform_3(%arg0: i32) -> (i32, i32) {
    %c0_i32 = arith.constant 0 : i32
    %c0_i32_0 = arith.constant 0 : i32
    return %arg0, %c0_i32 : i32, i32
  }
  func.func @transform_4(%arg0: i32) -> (i32, i32) {
    %c0_i32 = arith.constant 0 : i32
    %c0_i32_0 = arith.constant 0 : i32
    return %arg0, %c0_i32 : i32, i32
  }
  func.func @transform_5(%arg0: i32) -> (i32, i32, i32) {
    %c0_i32 = arith.constant 0 : i32
    %c0_i32_0 = arith.constant 0 : i32
    %c0_i32_1 = arith.constant 0 : i32
    %c0_i32_2 = arith.constant 0 : i32
    return %c0_i32, %c0_i32_0, %c0_i32_1 : i32, i32, i32
  }
  func.func @transform_6(%arg0: i32) -> (i32, i32) {
    %c0_i32 = arith.constant 0 : i32
    %c0_i32_0 = arith.constant 0 : i32
    %c0_i32_1 = arith.constant 0 : i32
    return %c0_i32, %c0_i32_0 : i32, i32
  }
  func.func @transform_7(%arg0: i32) -> (i32, i32) {
    %c0_i32 = arith.constant 0 : i32
    %c0_i32_0 = arith.constant 0 : i32
    %c0_i32_1 = arith.constant 0 : i32
    return %c0_i32, %c0_i32_0 : i32, i32
  }
  func.func @transform_8(%arg0: i32) -> (i32, i32) {
    %c0_i32 = arith.constant 0 : i32
    %c0_i32_0 = arith.constant 0 : i32
    return %arg0, %c0_i32 : i32, i32
  }
}

</mosaic_0001>

<bundles_post_ra>
// kernel: diffscm_forward.1
= control target key start
LH: loop header
LB: loop body
LE: loop exit
PB: predicated region body
PF: predicated region fallthrough
CT: control target
= control target key end

     0   :  { %s1121_s27 = smov 0   ;;  %s1235_s0 = inlined_call_operand.vmem [shape: f32[64,32], index: 0, kind: input, shape index: {}]   ;;  %s1236_s1 = inlined_call_operand.vmem [shape: f32[64,1], index: 1, kind: input, shape index: {}]   ;;  %s1237_s2 = inlined_call_operand.vmem [shape: f32[64,32], index: 2, kind: input, shape index: {}]   ;;  %s1238_s3 = inlined_call_operand.vmem [shape: f32[64,32], index: 3, kind: input, shape index: {}]   ;;  %s1239_s4 = inlined_call_operand.vmem [shape: f32[64,32], index: 4, kind: input, shape index: {}]   ;;  %s1240_s5 = inlined_call_operand.vmem [shape: f32[2,32,32], index: 5, kind: input, shape index: {}]   ;;  %s1241_s6 = inlined_call_operand.vmem [shape: f32[32,64], index: 6, kind: input, shape index: {}]   ;;  %s1242_s7 = inlined_call_operand.vmem [shape: f32[8,32], index: 7, kind: input, shape index: {}]   ;;  %s1243_s8 = inlined_call_operand.vmem [shape: f32[64,32], index: 8, kind: output, shape index: {}]  }
   0x1 LB: > { %s926_s28 = sadd.s32 4294967295, %s1071_s27   ;;  %p930_p0 = scmp.ge.s32.totalorder %s1071_s27, 1  ;;  %s1071_s27 = sphi %s1121_s27, %s18_s27  }
   0x2   : > { %p307_p1 = scmp.lt.s32.totalorder %s1071_s27, 5 }
   0x4   : > { %p308_p2 = pnand %p930_p0, %p307_p1 }
   0x5   : > { %v436_v0 = vld [vmem:[%s1240_s5] sm:$0xff] (!%p308_p2)  ;;  %v437_v1 = vld [vmem:[%s1240_s5 + $0x8] sm:$0xff] (!%p308_p2)  ;;  %v438_v2 = vld [vmem:[%s1240_s5 + $0x10] sm:$0xff] (!%p308_p2)  ;;  %s943_s13 = sshll.u32 (!%p308_p2), %s926_s28, 4  ;;  %v398_v3 = vlaneseq (!%p308_p2)  ;;  %s931_s16 = sshll.u32 (!%p308_p2), %s926_s28, 1  ;;  %vm460_vm4 = vcmask (!%p308_p2), 261120  }
   0x6   : > { %311 = sbr.rel (%p308_p2) target bundleno = 865 (0x361), region = 52  ;;  %v1012_v4 = vpack.c.bf16 (!%p308_p2), %v437_v1, %v436_v0  ;;  %v439_v5 = vld [vmem:[%s1240_s5 + $0x18] sm:$0xff] (!%p308_p2)  ;;  %v401_v6 = vstv (!%p308_p2), %s943_s13  ;;  %p362_p3 = scmp.lt.s32.totalorder (!%p308_p2), %s931_s16, 7  ;;  %v944_v38 = vld [vmem:[%s1240_s5 + $0x20] sm:$0xff] (!%p308_p2)  ;;  %v945_v39 = vld [vmem:[%s1240_s5 + $0x28] sm:$0xff] (!%p308_p2) }
   0x7   : > { %v1016_v7 = vpack.c.bf16 (!%p308_p2), %v439_v5, %v438_v2  ;;  %v399_v8 = vshrl.u32 (!%p308_p2), %v398_v3, 7  ;;  %v1020_v40 = vpack.c.bf16 (!%p308_p2), %v945_v39, %v944_v38  ;;  %v946_v41 = vld [vmem:[%s1240_s5 + $0x30] sm:$0xff] (!%p308_p2)  ;;  %v947_v42 = vld [vmem:[%s1240_s5 + $0x38] sm:$0xff] (!%p308_p2)  ;;  %v948_v44 = vld [vmem:[%s1242_s7] ss:$0 sm:$0xff] (!%p308_p2)  ;;  %s1073_s30 = smov (!%p308_p2), 32  }
   0x8   : > { %1013 = vmatprep.subr.bf16.mxu0 (!%p308_p2), %v1012_v4  ;;  %v1024_v43 = vpack.c.bf16 (!%p308_p2), %v947_v42, %v946_v41  ;;  %v951_v47 = vld [vmem:[%s1242_s7 + $0x1] ss:$0 sm:$0xff] (!%p308_p2)  ;;  %v642_v57 = vld [vmem:[%s1241_s6 + $0x8] sm:$0xff] (!%p308_p2)  ;;  %v643_v59 = vld [vmem:[%s1241_s6 + $0x10] sm:$0xff] (!%p308_p2)  ;;  %s1075_s14 = smov (!%p308_p2), 96  }
   0x9   : > { %1015 = vmatpush3.bf16.msra.mxu0 (!%p308_p2), %v1012_v4  ;;  %v400_v9 = vadd.s32 (!%p308_p2), 8, %v399_v8  ;;  %v402_v10 = vadd.s32 (!%p308_p2), %v401_v6, %v399_v8  ;;  %1021 = vmatprep.subr.bf16.mxu1 (!%p308_p2), %v1020_v40  ;;  %v641_v56 = vld [vmem:[%s1241_s6] sm:$0xff] (!%p308_p2)  ;;  %v644_v60 = vld [vmem:[%s1241_s6 + $0x18] sm:$0xff] (!%p308_p2) }
   0xa   : > { %1017 = vmatprep.subr.bf16.mxu0 (!%p308_p2), %v1016_v7  ;;  %1023 = vmatpush3.bf16.msra.mxu1 (!%p308_p2), %v1020_v40  ;;  %v1028_v58 = vpack.c.bf16 (!%p308_p2), %v642_v57, %v641_v56  ;;  %v1032_v61 = vpack.c.bf16 (!%p308_p2), %v644_v60, %v643_v59  ;;  %v958_v62 = vld [vmem:[%s1242_s7 + $0x4] ss:$0 sm:$0xff] (!%p308_p2)  ;;  %v952_v1 = vld [vmem:[%s1242_s7 + $0x2] ss:$0 sm:$0xff] (!%p308_p2)  ;;  %v957_v57 = vld [vmem:[%s1242_s7 + $0x3] ss:$0 sm:$0xff] (!%p308_p2) }
   0xb   : > { %v403_v11 = vadd.s32 (!%p308_p2), %v401_v6, %v400_v9  ;;  %v404_v12 = vcvt.s32.f32 (!%p308_p2), %v402_v10  ;;  %1025 = vmatprep.subr.bf16.mxu1 (!%p308_p2), %v1024_v43  ;;  %737 = vrot.lane.b32.xlu0 (!%p308_p2), %v958_v62, %s1073_s30 }
   0xd   : > { %1019 = vmatpush3.bf16.msra.mxu0 %v1016_v7  ;;  %v405_v13 = vcvt.s32.f32 %v403_v11  ;;  %v406_v14 = vmul.f32 0.016949153, %v404_v12  ;;  %s1245_s16 = smov (!%p362_p3, %s931_s16), 7 }
   0xe   : > { %s1147_s17 = sshll.u32 %s1245_s16, 3  ;;  %1027 = vmatpush3.bf16.msra.mxu1 %v1024_v43  ;;  %1029 = vmatprep.subr.bf16.mxu0 %v1028_v58 }
   0xf   : > { %v407_v15 = vmul.f32 0.016949153, %v405_v13  ;;  %v408_v16 = vmin.f32 %v406_v14, 1.0  ;;  %s377_s20 = scalar_lea.vmem %s1237_s2, %s1147_s17  ;;  %s383_s23 = scalar_lea.vmem %s1238_s3, %s1147_s17  ;;  %v1074_v14 = vmov 0  }
  0x10   : > { %v430_v25 = vld [vmem:[%s377_s20] sm:$0xff]  ;;  %v431_v29 = vld [vmem:[%s377_s20 + $0x8] sm:$0xff]  ;;  %s389_s29 = scalar_lea.vmem %s1239_s4, %s1147_s17  ;;  %s371_s13 = scalar_lea.vmem %s1236_s1, %s1147_s17  ;;  %1048 = vset.pattern.permute.xlu1 %v1074_v14  ;;  %1047 = vset.pattern.permute.xlu0 %v1074_v14 }
  0x11   : > { %v409_v17 = vmin.f32 %v407_v15, 1.0  ;;  %v1141_v18 = vsub.f32 1.0, %v408_v16  ;;  %v432_v30 = vld [vmem:[%s383_s23] sm:$0xff]  ;;  %v433_v34 = vld [vmem:[%s383_s23 + $0x8] sm:$0xff]  ;;  %v458_v46 = vmul.f32 %v948_v44, %v408_v16  ;;  %s365_s20 = scalar_lea.vmem %s1235_s0, %s1147_s17  ;;  %s395_s23 = scalar_lea.vmem %s1243_s8, %s1147_s17 }
  0x12   : > { %v435_v63 = vld [vmem:[%s389_s29 + $0x8] sm:$0xff]  ;;  %v434_v0 = vld [vmem:[%s389_s29] sm:$0xff] }
  0x13   : > { %v1143_v19 = vsub.f32 1.0, %v409_v17  ;;  %1049 = vrsqrt.f32 %v1141_v18  ;;  %vm414_vm0 = vcmp.eq.f32.partialorder %v1141_v18, inf  ;;  %v417_v21 = vand.u32 2147483648, %v1141_v18  ;;  %776 = vrot.lane.b32.xlu1 %v435_v63, %s1073_s30  ;;  %774 = vrot.lane.b32.xlu0 %v434_v0, %s1073_s30  ;;  %v428_v12 = vld [vmem:[%s371_s13] sm:$0xff]  ;;  %v429_v15 = vld [vmem:[%s371_s13 + $0x8] sm:$0xff] }
  0x14   : > { %vm416_vm1 = vcmp.eq.f32.partialorder %v1141_v18, 0.0  ;;  %v459_v45 = vmul.f32 %v948_v44, %v409_v17  ;;  %v792_v13 = vsub.f32 1.0, %v428_v12  ;;  %v793_v16 = vsub.f32 1.0, %v429_v15  ;;  %v426_v62 = vld [vmem:[%s365_s20] sm:$0xff] }
  0x15   : > { %1051 = vrsqrt.f32 %v1143_v19  ;;  %vm421_vm2 = vcmp.eq.f32.partialorder %v1143_v19, inf  ;;  %v424_v24 = vand.u32 2147483648, %v1143_v19  ;;  %vm423_vm3 = vcmp.eq.f32.partialorder %v1143_v19, 0.0 }
  0x17   : > { %796 = vperm.xlu1 %1048, %v792_v13   ;;  %808 = vperm.xlu0 %1047, %v428_v12  }
  0x1b   : > { %801 = vperm.xlu1 %1048, %v793_v16  }
  0x1d   : > { %v1050_v20 = vpop.eup %1049 }
  0x1e   : > { %v413_v22 = vmul.f32 %v1050_v20, %v1141_v18 }
  0x1f   : > { %v1052_v23 = vpop.eup %1051  ;;  %813 = vperm.xlu1 %1048, %v429_v15  }
  0x20   : > { %v415_v26 = vsel %vm414_vm0, %v1141_v18, %v413_v22  ;;  %v420_v27 = vmul.f32 %v1052_v23, %v1143_v19 }
  0x21   : > { %v418_v28 = vsel %vm416_vm1, %v417_v21, %v415_v26 }
  0x22   : > { %v422_v31 = vsel %vm421_vm2, %v1143_v19, %v420_v27  ;;  %v450_v32 = vmul.f32 %v430_v25, %v418_v28 }
  0x23   : > { %v425_v33 = vsel %vm423_vm3, %v424_v24, %v422_v31 }
  0x24   : > { %v451_v35 = vmul.f32 %v431_v29, %v425_v33  ;;  %v452_v36 = vadd.f32 %v450_v32, %v432_v30 }
  0x26   : > { %v453_v37 = vadd.f32 %v451_v35, %v433_v34  ;;  %987 = vmatprep.mubr.msk.f32.mxu0 %vm460_vm4, %v452_v36 }
  0x28   : > { %988 = vmatmul.mubr.msk.f32.vlgmr.msra.gmra.mrb[0].mxu0 %vm460_vm4, %v453_v37 }
  0x29   : > { %1031 = vmatpush3.bf16.msra.mxu0 %v1028_v58 }
  0x2a   : > { %1033 = vmatprep.subr.bf16.mxu0 %v1032_v61 }
  0x2d   : > { %1035 = vmatpush3.bf16.msra.mxu0 %v1032_v61 }
  0x7d   : > { %v738_v17 = vpop.permute.xlu0 %737 }
  0xfb   : > { %v989_v48 = vpop.f32.mrb[0].mxu0 }
  0xfc   : > { %v539_v49 = vadd.f32 %v989_v48, %v459_v45  ;;  %v533_v50 = vpop.f32.mrb[1].mxu0 }
  0xfd   : > { %v534_v51 = vadd.f32 %v533_v50, %v458_v46  ;;  %v777_v46 = vpop.permute.xlu1 %776 }
  0xfe   : > { %v547_v52 = vadd.f32 %v951_v47, %v539_v49  ;;  %v775_v49 = vpop.permute.xlu0 %774 }
  0xff   : > { %v546_v53 = vadd.f32 %v951_v47, %v534_v51 }
 0x100   : > { %v549_v55 = vmax.f32 %v547_v52, 0.0 }
 0x101   : > { %v548_v54 = vmax.f32 %v546_v53, 0.0 }
 0x102   : > { %v809_v56 = vpop.permute.xlu0 %808 }
 0x103   : > { %998 = vmatprep.mubr.msk.f32.mxu1 %vm460_vm4, %v548_v54  ;;  %v797_v54 = vpop.permute.xlu1 %796 }
 0x104   : > { %999 = vmatmul.mubr.msk.f32.vlgmr.msra.gmra.mrb[0].mxu1 %vm460_vm4, %v549_v55 }
 0x107   : > { %v802_v55 = vpop.permute.xlu1 %801 }
 0x10b   : > { %v814_v58 = vpop.permute.xlu1 %813 }
 0x1d7   : > { %v1000_v2 = vpop.f32.mrb[0].mxu1 }
 0x1d8   : > { %v632_v3 = vadd.f32 %v1000_v2, %v952_v1  ;;  %v626_v4 = vpop.f32.mrb[1].mxu1 }
 0x1d9   : > { %v627_v5 = vadd.f32 %v952_v1, %v626_v4  ;;  %v427_v1 = vld [vmem:[%s365_s20 + $0x8] sm:$0xff]  ;;  %v804_v4 = vmul.f32 %v797_v54, %v426_v62 }
 0x1da   : > { %1053 = vtanh.f32 %v632_v3 }
 0x1db   : > { %1055 = vtanh.f32 %v627_v5 }
 0x1e4   : > { %v1054_v6 = vpop.eup %1053 }
 0x1e5   : > { %v1056_v7 = vpop.eup %1055  ;;  %v638_v8 = vmul.f32 %v1054_v6, %v1143_v19  ;;  %v805_v6 = vmul.f32 %v802_v55, %v427_v1 }
 0x1e6   : > { %v637_v9 = vmul.f32 %v1056_v7, %v1141_v18 }
 0x1e7   : > { %v640_v11 = vadd.f32 %v638_v8, %v453_v37 }
 0x1e8   : > { %v639_v10 = vadd.f32 %v637_v9, %v452_v36 }
 0x1ea   : > { %1009 = vmatprep.mubr.msk.f32.mxu0 %vm460_vm4, %v639_v10 }
 0x1eb   : > { %1010 = vmatmul.mubr.msk.f32.vlgmr.msra.gmra.mrb[2].mxu0 %vm460_vm4, %v640_v11 }
 0x2be   : > { %v1011_v18 = vpop.f32.mrb[2].mxu0 }
 0x2bf   : > { %v741_v19 = vadd.f32 %v1011_v18, %v738_v17  ;;  %v717_v20 = vpop.f32.mrb[3].mxu0  ;;  %v731_v59 = vadd.f32 %v1011_v18, %v957_v57 }
 0x2c0   : > { %v740_v21 = vadd.f32 %v738_v17, %v717_v20  ;;  %v730_v60 = vadd.f32 %v957_v57, %v717_v20 }
 0x2c1   : > { %v745_v22 = vand.u32 2147483647, %v741_v19  ;;  %v743_v42 = vmax.f32 %v741_v19, 0.0 }
 0x2c2   : > { %v744_v23 = vand.u32 2147483647, %v740_v21  ;;  %v742_v45 = vmax.f32 %v740_v21, 0.0 }
 0x2c3   : > { %v747_v24 = vsub.f32 0.0, %v745_v22 }
 0x2c4   : > { %v746_v25 = vsub.f32 0.0, %v744_v23 }
 0x2c5   : > { %v750_v26 = vmul.f32 1.442695, %v747_v24 }
 0x2c6   : > { %v748_v27 = vmul.f32 1.442695, %v746_v25 }
 0x2c7   : > { %1057 = vpow2.f32 %v750_v26 }
 0x2c8   : > { %1059 = vpow2.f32 %v748_v27 }
 0x2d1   : > { %v1058_v28 = vpop.eup %1057 }
 0x2d2   : > { %v1060_v29 = vpop.eup %1059  ;;  %v761_v30 = vadd.f32 1.0, %v1058_v28  ;;  %v764_v32 = vmul.f32 -0.5, %v1058_v28  ;;  %v767_v35 = vand.u32 2147483647, %v1058_v28 }
 0x2d3   : > { %v752_v31 = vadd.f32 1.0, %v1060_v29  ;;  %v755_v33 = vmul.f32 -0.5, %v1060_v29  ;;  %v758_v37 = vand.u32 2147483647, %v1060_v29 }
 0x2d4   : > { %1061 = vlog2.f32 %v761_v30  ;;  %v765_v34 = vadd.f32 1.0, %v764_v32  ;;  %vm768_vm5 = vcmp.lt.f32.partialorder %v767_v35, 0.0004427343 }
 0x2d5   : > { %1063 = vlog2.f32 %v752_v31  ;;  %v756_v36 = vadd.f32 1.0, %v755_v33  ;;  %vm759_vm6 = vcmp.lt.f32.partialorder %v758_v37, 0.0004427343 }
 0x2d6   : > { %v766_v41 = vmul.f32 %v1058_v28, %v765_v34 }
 0x2d7   : > { %v757_v44 = vmul.f32 %v1060_v29, %v756_v36 }
 0x2de   : > { %v1062_v38 = vpop.eup %1061 }
 0x2df   : > { %v1064_v39 = vpop.eup %1063  ;;  %v763_v40 = vmul.f32 0.6931472, %v1062_v38 }
 0x2e0   : > { %v754_v43 = vmul.f32 0.6931472, %v1064_v39 }
 0x2e1   : > { %v769_v47 = vsel %vm768_vm5, %v766_v41, %v763_v40 }
 0x2e2   : > { %v771_v48 = vadd.f32 %v769_v47, %v743_v42  ;;  %v760_v50 = vsel %vm759_vm6, %v757_v44, %v754_v43 }
 0x2e3   : > { %v770_v51 = vadd.f32 %v760_v50, %v742_v45 }
 0x2e4   : > { %v781_v52 = vmul.f32 %v777_v46, %v771_v48 }
 0x2e5   : > { %v780_v53 = vmul.f32 %v775_v49, %v770_v51 }
 0x2e6   : > { %786 = vrot.lane.b32.xlu1 %v781_v52, %s1075_s14 }
 0x2e7   : > { %784 = vrot.lane.b32.xlu0 %v780_v53, %s1075_s14 }
 0x358   : > { %v787_v61 = vpop.permute.xlu1 %786 }
 0x359   : > { %v791_v63 = vadd.f32 %v787_v61, %v731_v59  ;;  %v785_v0 = vpop.permute.xlu0 %784 }
 0x35a   : > { %v790_v2 = vadd.f32 %v785_v0, %v730_v60 }
 0x35b   : > { %v817_v3 = vmul.f32 %v814_v58, %v791_v63 }
 0x35c   : > { %v816_v5 = vmul.f32 %v809_v56, %v790_v2 }
 0x35d   : > { %v819_v8 = vadd.f32 %v817_v3, %v805_v6 }
 0x35e   : > { %v818_v7 = vadd.f32 %v816_v5, %v804_v4 }
 0x35f   : > { %821 = vst.msk [vmem:[%s395_s23 + $0x8] sm:$0xff] %vm460_vm4, %v819_v8 }
 0x360   : > { %820 = vst.msk [vmem:[%s395_s23] sm:$0xff] %vm460_vm4, %v818_v7 }
 0x361 PF: > { %s18_s27 = sadd.s32 1, %s1071_s27  }
 0x362   : > { %p15_p4 = scmp.ge.s32.totalorder %s18_s27, 6  }
 0x364   :  { %17 = sbr.rel (!%p15_p4) target bundleno = 1 (0x1), region = 95 }

</bundles_post_ra>
